<compile_context>
chip_gen: v5e
topology: v5e:2x2
jax: 0.10.0
libtpu: 0.0.40
codegen_flags: <defaults>
</compile_context>

<pallas_src>
import functools
import math

import jax
import jax.numpy as jnp
from jax.experimental import pallas as pl
from jax.experimental.pallas import tpu as pltpu


def attention_head_kernel(x_ref, w_ref, b_ref, o_ref, *, scale):
    """One grid step: full self-attention for Bt sequences.

    x_ref : (Bt, S, D)   bf16
    w_ref : (D, 3*dk)    bf16   fused [Wq | Wk | Wv]   (grid-invariant)
    b_ref : (1, 3*dk)    f32    fused [bq | bk | bv]   (grid-invariant)
    o_ref : (Bt, S, dk)  bf16
    """
    bt, s_len, d = x_ref.shape
    dk = o_ref.shape[-1]

    # Fused Q/K/V projection: one (Bt*S, D) x (D, 3*dk) MXU matmul with f32
    # accumulation, bias add in f32.
    x2 = x_ref[...].reshape(bt * s_len, d)                        # bf16
    qkv = jnp.dot(x2, w_ref[...],
                  preferred_element_type=jnp.float32) + b_ref[...]
    qkv = qkv.reshape(bt, s_len, 3 * dk)

    # Fold 1/sqrt(dk) into Q (S*dk elements, not the (S,S) score matrix),
    # then cast operands to bf16 for the MXU.
    q = (qkv[:, :, :dk] * scale).astype(jnp.bfloat16)
    k = qkv[:, :, dk:2 * dk].astype(jnp.bfloat16)
    v = qkv[:, :, 2 * dk:].astype(jnp.bfloat16)

    # Scores: contract on dk (no explicit transpose), f32 accumulation.
    s = jnp.einsum('bqc,bkc->bqk', q, k,
                   preferred_element_type=jnp.float32)            # (Bt,S,S) f32

    # Max-stabilized softmax with deferred normalization: divide is moved to
    # the (S, dk) output and routed to the EUP via an approximate reciprocal.
    p = jnp.exp(s - jnp.max(s, axis=-1, keepdims=True))
    row_sum = jnp.sum(p, axis=-1, keepdims=True)                  # (Bt,S,1) f32

    out = jnp.einsum('bqk,bkd->bqd', p.astype(jnp.bfloat16), v,
                     preferred_element_type=jnp.float32)          # (Bt,S,dk)
    out = out * pl.reciprocal(row_sum, approx=True)

    # TODO(synk): dropout on the attention matrix omitted (inference
    # semantics; training parity would need pltpu.prng_* masking in-kernel).
    o_ref[...] = out.astype(o_ref.dtype)


def _choose_batch_tile(batch, s_len, d_model, dk, target_bytes=4 << 20):
    """Pick how many sequences each grid step processes."""
    # Double-buffered bf16 x/out blocks + per-sequence f32 intermediates.
    per_b = (2 * (s_len * d_model * 2 + s_len * dk * 2)
             + 4 * (s_len * s_len + 3 * s_len * dk))
    bt = max(1, min(batch, target_bytes // max(per_b, 1)))
    if batch >= 2:
        # Keep >= 2 grid steps so v7x megacore has work for both TensorCores.
        bt = min(bt, batch // 2)
    while batch % bt:       # make bt a divisor of batch
        bt -= 1
    return bt


def attention_head(x, wq, bq, wk, bk, wv, bv, *, out_dtype=jnp.bfloat16):
    """x: (B, S, D) f32. Weights stored as (D, d_k) (transpose of nn.Linear
    layout, so the kernel does x @ W); biases (d_k,). Returns (B, S, d_k)."""
    B, S, D = x.shape
    dk = wq.shape[1]
    scale = 1.0 / math.sqrt(dk)

    bt = _choose_batch_tile(B, S, D, dk)
    grid = (B // bt,)

    # bf16 operands for the MXU; fused weights/biases stay resident in VMEM
    # across the whole grid (grid-invariant BlockSpecs).
    x_bf = x.astype(jnp.bfloat16)
    w_qkv = jnp.concatenate([wq, wk, wv], axis=1).astype(jnp.bfloat16)  # (D,3dk)
    b_qkv = jnp.concatenate([bq, bk, bv]).reshape(1, 3 * dk).astype(jnp.float32)

    flops = B * (2 * S * D * 3 * dk        # fused QKV projection
                 + 2 * S * S * dk          # Q K^T
                 + 2 * S * S * dk)         # attn V
    bytes_accessed = (B * S * D * 2                         # x (bf16)
                      + D * 3 * dk * 2 + 3 * dk * 4         # fused weights + biases
                      + B * S * dk * jnp.dtype(out_dtype).itemsize)
    cost = pl.CostEstimate(flops=flops, transcendentals=B * S * S,
                           bytes_accessed=bytes_accessed)

    out = pl.pallas_call(
        functools.partial(attention_head_kernel, scale=scale),
        out_shape=jax.ShapeDtypeStruct((B, S, dk), out_dtype),
        grid=grid,
        in_specs=[
            pl.BlockSpec((bt, S, D), lambda b: (b, 0, 0)),     # x, tiled over batch
            pl.BlockSpec((D, 3 * dk), lambda b: (0, 0)),       # fused Wq|Wk|Wv
            pl.BlockSpec((1, 3 * dk), lambda b: (0, 0)),       # fused bq|bk|bv
        ],
        out_specs=pl.BlockSpec((bt, S, dk), lambda b: (b, 0, 0)),
        compiler_params=pltpu.CompilerParams(
            dimension_semantics=("parallel",),   # megacore: shard batch on v7x
            vmem_limit_bytes=48 << 20,           # >32 MiB default, headroom under v7x's 64 MiB
        ),
        cost_estimate=cost,
    )(x_bf, w_qkv, b_qkv)

    return out


def init_linear_params(key, in_features, out_features):
    """Deterministic init matching nn.Linear default U(-1/sqrt(in), 1/sqrt(in)).
    Stored as (in, out) so the kernel computes x @ W."""
    k_w, k_b = jax.random.split(key)
    bound = 1.0 / math.sqrt(in_features)
    w = jax.random.uniform(k_w, (in_features, out_features),
                           jnp.float32, -bound, bound)
    b = jax.random.uniform(k_b, (out_features,), jnp.float32, -bound, bound)
    return w, b


if __name__ == "__main__":
    # Small shapes consistent with the module: batch=2, seq=8, d_model=32, d_k=16.
    B, S, D, DK = 2, 8, 32, 16

    key = jax.random.PRNGKey(0)
    kx, kq, kk, kv = jax.random.split(key, 4)

    x = jax.random.normal(kx, (B, S, D), jnp.float32)
    wq, bq = init_linear_params(kq, D, DK)
    wk, bk = init_linear_params(kk, D, DK)
    wv, bv = init_linear_params(kv, D, DK)

    y = attention_head(x, wq, bq, wk, bk, wv, bv)
    y = jax.block_until_ready(y)
    y32 = y.astype(jnp.float32)

    bf = jnp.bfloat16
    inv_sqrt_dk = 1.0 / math.sqrt(DK)

    # Reference 1: mirrors the kernel's numerics (bf16 MXU inputs, f32
    # accumulation, scale folded into Q, deferred softmax normalization).
    x_bf = x.astype(bf)

    def proj(w, b):
        return jnp.einsum('bsd,dk->bsk', x_bf, w.astype(bf),
                          preferred_element_type=jnp.float32) + b

    q_r = (proj(wq, bq) * inv_sqrt_dk).astype(bf)
    k_r = proj(wk, bk).astype(bf)
    v_r = proj(wv, bv).astype(bf)
    s_r = jnp.einsum('bqc,bjc->bqj', q_r, k_r, preferred_element_type=jnp.float32)
    p_r = jnp.exp(s_r - s_r.max(-1, keepdims=True))
    y_bf_ref = (jnp.einsum('bqj,bjk->bqk', p_r.astype(bf), v_r,
                           preferred_element_type=jnp.float32)
                / p_r.sum(-1, keepdims=True))
    assert jnp.allclose(y32, y_bf_ref, atol=2e-2, rtol=2e-2), \
        "mismatch vs bf16-matched reference"

    # Reference 2: full-f32 PyTorch-semantics reference; loose tolerance just
    # bounds the bf16-MXU / approx-reciprocal rounding error.
    q_f, k_f, v_f = x @ wq + bq, x @ wk + bk, x @ wv + bv
    s_f = jnp.einsum('bqc,bjc->bqj', q_f, k_f) * inv_sqrt_dk
    a_f = jax.nn.softmax(s_f, axis=-1)
    y_f32_ref = jnp.einsum('bqj,bjk->bqk', a_f, v_f)
    assert jnp.allclose(y32, y_f32_ref, atol=1e-1, rtol=1e-1), \
        "mismatch vs f32 reference (bf16 error out of bounds)"

    print("KERNEL_OK")
</pallas_src>

<mosaic_0001>
module attributes {stable_mosaic.version = 11 : i64} {
  func.func @attention_head_kernel(%arg0: i32, %arg1: memref<1x8x32xbf16, #tpu.memory_space<vmem>>, %arg2: memref<32x48xbf16, #tpu.memory_space<vmem>>, %arg3: memref<1x48xf32, #tpu.memory_space<vmem>>, %arg4: memref<1x8x16xbf16, #tpu.memory_space<vmem>>) attributes {dimension_semantics = [#tpu.dimension_semantics<parallel>], iteration_bounds = array<i64: 2>, scalar_prefetch = 0 : i64, scratch_operands = 0 : i64, tpu.core_type = #tpu.core_type<tc>, window_params = [{transform_indices = @transform_0, window_bounds = array<i64: 1, 8, 32>}, {pipeline_mode = #tpu.pipeline_mode<synchronous>, transform_indices = @transform_1, window_bounds = array<i64: 32, 48>}, {pipeline_mode = #tpu.pipeline_mode<synchronous>, transform_indices = @transform_2, window_bounds = array<i64: 1, 48>}, {transform_indices = @transform_3, window_bounds = array<i64: 1, 8, 16>}]} {
    %c0 = arith.constant 0 : index
    %c0_0 = arith.constant 0 : index
    %c0_1 = arith.constant 0 : index
    %0 = vector.load %arg1[%c0, %c0_0, %c0_1] : memref<1x8x32xbf16, #tpu.memory_space<vmem>>, vector<1x8x32xbf16>
    %1 = vector.shape_cast %0 : vector<1x8x32xbf16> to vector<8x32xbf16>
    %c0_2 = arith.constant 0 : index
    %c0_3 = arith.constant 0 : index
    %2 = vector.load %arg2[%c0_2, %c0_3] : memref<32x48xbf16, #tpu.memory_space<vmem>>, vector<32x48xbf16>
    %cst = arith.constant dense<0.000000e+00> : vector<8x48xf32>
    %3 = tpu.matmul %1, %2, %cst {dimension_numbers = #tpu.dot_dimension_numbers<[1], [0], [0], [1], [0, 0, 1, 1], [], []>} : vector<8x32xbf16>, vector<32x48xbf16>, vector<8x48xf32> -> vector<8x48xf32>
    %c0_4 = arith.constant 0 : index
    %c0_5 = arith.constant 0 : index
    %4 = vector.load %arg3[%c0_4, %c0_5] : memref<1x48xf32, #tpu.memory_space<vmem>>, vector<1x48xf32>
    %5 = vector.broadcast %4 : vector<1x48xf32> to vector<8x48xf32>
    %6 = arith.addf %3, %5 : vector<8x48xf32>
    %7 = vector.shape_cast %6 : vector<8x48xf32> to vector<1x8x48xf32>
    %8 = vector.extract_strided_slice %7 {offsets = [0, 0, 0], sizes = [1, 8, 16], strides = [1, 1, 1]} : vector<1x8x48xf32> to vector<1x8x16xf32>
    %cst_6 = arith.constant 2.500000e-01 : f32
    %9 = vector.broadcast %cst_6 : f32 to vector<1x8x16xf32>
    %10 = arith.mulf %8, %9 : vector<1x8x16xf32>
    %11 = arith.truncf %10 : vector<1x8x16xf32> to vector<1x8x16xbf16>
    %12 = vector.extract_strided_slice %7 {offsets = [0, 0, 16], sizes = [1, 8, 16], strides = [1, 1, 1]} : vector<1x8x48xf32> to vector<1x8x16xf32>
    %13 = arith.truncf %12 : vector<1x8x16xf32> to vector<1x8x16xbf16>
    %14 = vector.extract_strided_slice %7 {offsets = [0, 0, 32], sizes = [1, 8, 16], strides = [1, 1, 1]} : vector<1x8x48xf32> to vector<1x8x16xf32>
    %15 = arith.truncf %14 : vector<1x8x16xf32> to vector<1x8x16xbf16>
    "tpu.trace_start"() <{level = 10 : i32, message = "bqc,bkc->bqk"}> : () -> ()
    %cst_7 = arith.constant dense<0.000000e+00> : vector<1x8x8xf32>
    %16 = tpu.matmul %11, %13, %cst_7 {dimension_numbers = #tpu.dot_dimension_numbers<[2], [2], [1], [1], [0, 0, 0, 1, 1, 1], [0], [0]>} : vector<1x8x16xbf16>, vector<1x8x16xbf16>, vector<1x8x8xf32> -> vector<1x8x8xf32>
    "tpu.trace_stop"() : () -> ()
    %cst_8 = arith.constant dense<0xFF800000> : vector<1x8xf32>
    %17 = vector.multi_reduction <maximumf>, %16, %cst_8 [2] : vector<1x8x8xf32> to vector<1x8xf32>
    %18 = vector.shape_cast %17 : vector<1x8xf32> to vector<1x8x1xf32>
    %19 = vector.broadcast %18 : vector<1x8x1xf32> to vector<1x8x8xf32>
    %20 = arith.subf %16, %19 : vector<1x8x8xf32>
    %21 = math.exp %20 : vector<1x8x8xf32>
    %cst_9 = arith.constant dense<0.000000e+00> : vector<1x8xf32>
    %22 = vector.multi_reduction <add>, %21, %cst_9 [2] : vector<1x8x8xf32> to vector<1x8xf32>
    %23 = vector.shape_cast %22 : vector<1x8xf32> to vector<1x8x1xf32>
    %24 = arith.truncf %21 : vector<1x8x8xf32> to vector<1x8x8xbf16>
    "tpu.trace_start"() <{level = 10 : i32, message = "bqk,bkd->bqd"}> : () -> ()
    %cst_10 = arith.constant dense<0.000000e+00> : vector<1x8x16xf32>
    %25 = tpu.matmul %24, %15, %cst_10 {dimension_numbers = #tpu.dot_dimension_numbers<[2], [1], [1], [2], [0, 0, 0, 1, 1, 2], [0], [0]>} : vector<1x8x8xbf16>, vector<1x8x16xbf16>, vector<1x8x16xf32> -> vector<1x8x16xf32>
    "tpu.trace_stop"() : () -> ()
    %26 = tpu.reciprocal %23 {approx = true} : vector<1x8x1xf32> -> vector<1x8x1xf32>
    %27 = vector.broadcast %26 : vector<1x8x1xf32> to vector<1x8x16xf32>
    %28 = arith.mulf %25, %27 : vector<1x8x16xf32>
    %29 = arith.truncf %28 : vector<1x8x16xf32> to vector<1x8x16xbf16>
    %c0_11 = arith.constant 0 : index
    %c0_12 = arith.constant 0 : index
    %c0_13 = arith.constant 0 : index
    %30 = vector.load %arg4[%c0_11, %c0_12, %c0_13] : memref<1x8x16xbf16, #tpu.memory_space<vmem>>, vector<1x8x16xbf16>
    tpu.vector_store %arg4[%c0_11, %c0_12, %c0_13], %29 {strides = array<i32>} : memref<1x8x16xbf16, #tpu.memory_space<vmem>>, vector<1x8x16xbf16>,
    return
  }
  func.func @transform_0(%arg0: i32) -> (i32, i32, i32) {
    %c0_i32 = arith.constant 0 : i32
    %c0_i32_0 = arith.constant 0 : i32
    %c0_i32_1 = arith.constant 0 : i32
    return %arg0, %c0_i32, %c0_i32_0 : i32, i32, i32
  }
  func.func @transform_1(%arg0: i32) -> (i32, i32) {
    %c0_i32 = arith.constant 0 : i32
    %c0_i32_0 = arith.constant 0 : i32
    %c0_i32_1 = arith.constant 0 : i32
    return %c0_i32, %c0_i32_0 : i32, i32
  }
  func.func @transform_2(%arg0: i32) -> (i32, i32) {
    %c0_i32 = arith.constant 0 : i32
    %c0_i32_0 = arith.constant 0 : i32
    %c0_i32_1 = arith.constant 0 : i32
    return %c0_i32, %c0_i32_0 : i32, i32
  }
  func.func @transform_3(%arg0: i32) -> (i32, i32, i32) {
    %c0_i32 = arith.constant 0 : i32
    %c0_i32_0 = arith.constant 0 : i32
    %c0_i32_1 = arith.constant 0 : i32
    return %arg0, %c0_i32, %c0_i32_0 : i32, i32, i32
  }
}

</mosaic_0001>

<bundles_post_ra>
// kernel: tpu_custom_call.1
= control target key start
LH: loop header
LB: loop body
LE: loop exit
PB: predicated region body
PF: predicated region fallthrough
CT: control target
= control target key end

     0   :  { %8 = vsyncpa [#allocation3], 0  ;;  %s799_s0 = inlined_call_operand.hbm [shape: bf16[2,8,32], index: 0, kind: input, shape index: {}]   ;;  %s800_s1 = inlined_call_operand.hbm [shape: bf16[32,48], index: 1, kind: input, shape index: {}]   ;;  %s801_s2 = inlined_call_operand.vmem [shape: f32[1,48], index: 2, kind: input, shape index: {}]   ;;  %s802_s3 = inlined_call_operand.hbm [shape: bf16[2,8,16], index: 3, kind: output, shape index: {}]  }
   0x1   :  { %10 = vsyncpa [#allocation3 + $0x1], 0 }
   0x2   :  { %11 = vsyncpa [#allocation6], 0 }
   0x3   :  { %12 = vsyncpa [#allocation4], 0 }
   0x4   :  { %14 = vsyncpa [#allocation4 + $0x1], 0  ;;  %s656_s12 = smov 0   ;;  %s658_s13 = smov 0  }
   0x5   :  { %s660_s14 = smov 0   ;;  %s662_s15 = smov 0  }
   0x6 LB: > { %s130_s18 = sshll.u32 %s800_s1, 4  ;;  %s680_s19 = sadd.s32 4294967295, %s629_s15   ;;  %s629_s15 = sphi %s662_s15, %s812_s15   ;;  %s625_s14 = sphi %s660_s14, %s811_s14   ;;  %s621_s13 = sphi %s658_s13, %s810_s13   ;;  %s617_s12 = sphi %s656_s12, %s809_s12   ;;  %s131_s18 = int_to_ptr.hbm [resolvable:$true] %s130_s18 }
   0x7   : > { %p407_p0 = scmp.ge.s32.totalorder %s629_s15, 1  ;;  %p41_p1 = scmp.eq.s32.totalorder %s680_s19, 0 }
   0x8   : > { %p119_p2 = scmp.lt.s32.totalorder %s629_s15, 3  ;;  %s631_s21 = smov [#allocation5]  }
   0x9   : > { %s132_s22 = sshll.u32 %s631_s21, 4  ;;  %s632_s23 = smov 64   ;;  %s133_s22 = int_to_ptr.vmem [resolvable:$true] %s132_s22 }
   0xa   : > { %p685_p3 = pnand %p407_p0, %p119_p2  ;;  %s633_s24 = smov 4  }
   0xb   : > { %s406_s25 = sadd.s32 4294967294, %s629_s15   ;;  %s696_s26 = sadd.s32 1, %s629_s15  }
   0xc   : > { %p441_p4 = pneg %p685_p3  ;;  %s27_s27 = sadd.s32 1, %s625_s14 }
   0xd   : > { %s24_s28 = ssub.s32 %s629_s15, %s696_s26  ;;  %p34_p7 = scmp.ne.s32.totalorder %s625_s14, %s621_s13 }
   0xe   : > { %p442_p6 = pnand %p441_p4, %p41_p1  ;;  %p25_p8 = scmp.eq.s32.totalorder %s24_s28, 0 }
   0xf   : > { %p35_p9 = scmp.eq.s32.totalorder %s629_s15, 0  ;;  %p40_p10 = scmp.ne.s32.totalorder %s621_s13, %s617_s12 }
  0x10   : > { %444 = dma.hbm_to_vmem [thread:$0]  (!%p442_p6), %s131_s18, 256, %s133_s22, [#allocation6], %s632_s23, %s632_s23, %s633_s24  }
  0x11   : > { %p106_p11 = scmp.eq.s32.totalorder %s680_s19, 1  ;;  %p712_p12 = por %p41_p1, %p40_p10 }
  0x12   : > { %s708_s29 = scalar_select %p25_p8, %s625_s14, %s27_s27  }
  0x13   : > { %p716_p13 = por %p106_p11, %p34_p7  ;;  %p112_p0 = scmp.eq.s32.totalorder %s406_s25, 1 }
  0x14   : > { %p36_p2 = por %p35_p9, %p34_p7  ;;  %s149_s5 = sand.u32 1, %s625_s14  }
  0x15   : > { %p721_p4 = por %p112_p0, %p40_p10  ;;  %p454_p6 = scmp.lt.s32.totalorder %s629_s15, 2 }
  0x16   : > { %s410_s7 = sshll.u32 %s149_s5, 2  ;;  %s411_s8 = sshll.u32 %s629_s15, 2 }
  0x17   : > { %s157_s11 = scalar_lea.hbm %s799_s0, %s411_s8  ;;  %s153_s17 = scalar_lea.vmem [#allocation2], %s410_s7 }
  0x18   : > { %s159_s16 = sshll.u32 %s157_s11, 4  ;;  %s161_s18 = sshll.u32 %s153_s17, 4  ;;  %s160_s16 = int_to_ptr.hbm [resolvable:$true] %s159_s16  ;;  %s162_s18 = int_to_ptr.vmem [resolvable:$true] %s161_s18 }
  0x19   : > { %p730_p8 = pnand %p454_p6, %p36_p2  ;;  %s150_s22 = scalar_lea.sflag [#allocation3], %s149_s5 }
  0x1a   : > { %s529_s23 = sshra.s32 %s160_s16, 4  ;;  %s536_s28 = scalar_lea.hbm %s799_s0, 8  ;;  %s530_s23 = int_to_ptr.hbm [resolvable:$true] %s529_s23 }
  0x1b   : > { %s531_s24 = scalar_lea.hbm %s530_s23, 4  ;;  %p533_p9 = pneg %p730_p8 }
  0x1c   : > { %p532_p7 = scmp.ne.s32.totalorder %s530_s23, %s531_s24  ;;  %p537_p0 = scmp.lt.s32.totalorder %s530_s23, %s799_s0 }
  0x1d   : > { %p538_p2 = scmp.lt.s32.totalorder %s536_s28, %s531_s24 }
  0x1e   : > { %p534_p10 = pnand %p533_p9, %p532_p7 }
  0x1f   : > { %p539_p6 = por %p538_p2, %p537_p0 }
  0x20   : > { %p535_p11 = pneg %p534_p10 }
  0x22   : > { %p540_p5 = pnand %p539_p6, %p535_p11 }
  0x24   : > { %543 = shalt.err (!%p540_p5)
}
  0x25   : > { %448 = dma.hbm_to_vmem [thread:$0]  (!%p730_p8), %s160_s16, 64, %s162_s18, %s150_s22  }
  0x26   : > { %170 = sbr.rel (%p685_p3) target bundleno = 707 (0x2c3), region = 32  ;;  %s747_s5 = sand.u32 (!%p685_p3), 1, %s621_s13  }
  0x27   : > { %s413_s9 = sshll.u32 (!%p685_p3), %s747_s5, 2  ;;  %s173_s10 = scalar_lea.sflag (!%p685_p3), [#allocation3], %s747_s5 }
  0x28   : > { %s176_s11 = scalar_lea.vmem (!%p685_p3), [#allocation2], %s413_s9 }
  0x2b   : > { %604 = dma.done.wait (%p712_p12), %s173_s10, 64  }
  0x2c   : > { %606 = vsyncadd (%p712_p12), %s173_s10, 4294967232 }
  0x2d   : > { %608 = dma.done.wait (%p41_p1), [#allocation6], 256  }
  0x2e   : > { %610 = vsyncadd (%p41_p1), [#allocation6], 4294967040  ;;  %v432_v0 = vld [vmem:[#allocation5 + $0x8] sm:$0xff]  ;;  %v431_v1 = vld [vmem:[#allocation5] sm:$0xff]  ;;  %vm227_vm0 = vcmask 261120   ;;  %s634_s30 = smov 96  }
  0x2f   : > { %237 = vmatpush.bf16.msra.mxu0 %v432_v0  ;;  %v206_v2 = vld [vmem:[%s176_s11] sm:$0xf]  ;;  %s635_s17 = smov 112   ;;  %vm252_vm1 = vcmask 130048   ;;  %vm288_vm2 = vcmask 1043456   ;;  %vm272_vm3 = vcmask 64512  }
  0x30   : > { %v494_v3 = vld [vmem:[%s801_s2] ss:$0 sm:$0xff]  ;;  %s428_s18 = sshll.u32 %s680_s19, 2  ;;  %s204_s24 = scalar_lea.vmem [#allocation7], %s413_s9  ;;  %vm308_vm4 = vcmask 125952  }
  0x31   : > { %s321_s23 = scalar_lea.hbm %s802_s3, %s428_s18  ;;  %s323_s25 = sshll.u32 %s204_s24, 4  ;;  %s324_s25 = int_to_ptr.vmem [resolvable:$true] %s323_s25 }
  0x32   : > { %s325_s27 = sshll.u32 %s321_s23, 4  ;;  %s311_s28 = scalar_lea.sflag [#allocation4], %s747_s5  ;;  %s326_s27 = int_to_ptr.hbm [resolvable:$true] %s325_s27 }
  0x33   : > { %238 = vmatpush.bf16.msra.mxu0 %v431_v1  ;;  %s573_s7 = sshra.s32 %s326_s27, 4  ;;  %s579_s9 = scalar_lea.hbm %s802_s3, 8  ;;  %s574_s7 = int_to_ptr.hbm [resolvable:$true] %s573_s7 }
  0x34   : > { %s575_s19 = scalar_lea.hbm %s574_s7, 4  ;;  %p580_p12 = scmp.lt.s32.totalorder %s574_s7, %s802_s3 }
  0x35   : > { %p576_p1 = scmp.ne.s32.totalorder %s574_s7, %s575_s19  ;;  %p581_p8 = scmp.lt.s32.totalorder %s579_s9, %s575_s19 }
  0x36   : > { %424 = vmatmul.msk.bf16.vlgmr.msra.gmra.mxu0 %vm227_vm0, %v206_v2 }
  0x37   : > { %p577_p3 = pnand %p576_p1, %p716_p13  ;;  %p582_p7 = por %p581_p8, %p580_p12 }
  0x39   : > { %p578_p5 = pneg %p577_p3 }
  0x3b   : > { %p583_p9 = pnand %p582_p7, %p578_p5 }
  0xb3   : > { %v240_v4 = vpop.f32.mrf.mxu0 }
  0xb4   : > { %v241_v5 = vadd.f32 %v494_v3, %v240_v4 }
  0xb6   : > { %v246_v6 = vpack.c.bf16 %v241_v5, %v241_v5  ;;  %v244_v14 = vmul.f32 0.25, %v241_v5 }
  0xb8   : > { %v248_v7 = vunpack.c.l.b16 %v246_v6  ;;  %v245_v15 = vpack.c.bf16 %v244_v14, %v244_v14 }
  0xba   : > { %v249_v8 = vpack.c.b16 %v248_v7, %v248_v7 }
  0xbb   : > { %v242_v9 = vpop.f32.mrf.mxu0 }
  0xbc   : > { %283 = vrot.lane.b32.xlu1 %v249_v8, %s634_s30  ;;  %250 = vrot.lane.b32.xlu0 %v249_v8, %s635_s17 }
 0x12e   : > { %v284_v10 = vpop.permute.xlu1 %283  ;;  %v251_v11 = vpop.permute.xlu0 %250 }
 0x12f   : > { %v257_v12 = vsel %vm252_vm1, %v251_v11, 0  ;;  %v290_v13 = vsel %vm288_vm2, %v284_v10, 0 }
 0x130   : > { %266 = vmatpush.bf16.xpose.msra.mxu1 %v257_v12  ;;  %299 = vmatpush.bf16.msra.mxu2 %v290_v13 }
 0x137   : > { %425 = vmatmul.msk.bf16.vlgmr.msra.gmra.mxu1 %vm252_vm1, %v245_v15 }
 0x1b4   : > { %v268_v16 = vpop.f32.mrf.mxu1 }
 0x1b5   : > { %v273_v17 = vsel %vm272_vm3, %v268_v16, -inf }
 0x1b6   : > { %274 = vmax.xlane.f32.xlu0 %v273_v17 }
 0x1bc   : > { %v270_v18 = vpop.f32.mrf.mxu1 }
 0x229   : > { %v275_v19 = vpop.xlane.xlu0 %274 }
 0x22a   : > { %v276_v20 = vsub.f32 %v268_v16, %v275_v19 }
 0x22c   : > { %v277_v21 = vmul.f32 1.442695, %v276_v20 }
 0x22e   : > { %495 = vpow2.f32 %v277_v21 }
 0x234   : > { %v496_v22 = vpop.eup %495 }
 0x235   : > { %v279_v23 = vsel %vm272_vm3, %v496_v22, 0.0  ;;  %v282_v24 = vpack.c.bf16 %v496_v22, %v496_v22 }
 0x236   : > { %280 = vadd.xlane.f32.xlu1 %v279_v23 }
 0x237   : > { %426 = vmatmul.msk.bf16.vlgmr.msra.gmra.mxu2 %vm272_vm3, %v282_v24 }
 0x2a9   : > { %v281_v25 = vpop.xlane.xlu1 %280 }
 0x2aa   : > { %497 = vrcp.f32 %v281_v25 }
 0x2b0   : > { %v498_v26 = vpop.eup %497 }
 0x2ba   : > { %v301_v27 = vpop.f32.mrf.mxu2 }
 0x2bb   : > { %v306_v28 = vmul.f32 %v498_v26, %v301_v27 }
 0x2bd   : > { %v307_v29 = vpack.c.bf16 %v306_v28, %v306_v28 }
 0x2bf   : > { %309 = vst.msk [vmem:[%s204_s24] sm:$0xf] %vm308_vm4, %v307_v29 }
 0x2c0   : > { %586 = shalt.err (!%p583_p9)
}
 0x2c1   : > { %439 = dma.vmem_to_hbm [thread:$0]  (%p716_p13), %s324_s25, 64, %s326_s27, %s311_s28  }
 0x2c2   : > { %v303_v30 = vpop.f32.mrf.mxu2 }
 0x2c3 PF: > { %s337_s5 = sand.u32 1, %s617_s12   ;;  %p808_p10 = scmp.ge.s32.totalorder %s629_s15, 2 }
 0x2c4   : > { %s338_s16 = scalar_lea.sflag [#allocation4], %s337_s5 }
 0x2c5   : > { %p450_p11 = pnand %p808_p10, %p721_p4 }
 0x2c7   : > { %p451_p0 = pneg %p450_p11 }
 0x2c9   : > { %612 = dma.done.wait (%p451_p0), %s338_s16, 64  }
 0x2ca   : > { %614 = vsyncadd (%p451_p0), %s338_s16, 4294967232  ;;  %p17_p2 = scmp.ge.s32.totalorder %s696_s26, 4   ;;  %s809_s12 = smov %s621_s13 }
 0x2cb   : > { %s810_s13 = smov %s625_s14  ;;  %s811_s14 = smov %s708_s29 }
 0x2cc   : > { %s812_s15 = smov %s696_s26  ;;  %19 = sbr.rel (!%p17_p2) target bundleno = 6 (0x6), region = 81 }
 0x2d1   :  { %344 = vsyncpa [#allocation3], 1 }
 0x2d2   :  { %346 = vsyncpa [#allocation3 + $0x1], 1 }
 0x2d3   :  { %347 = vsyncpa [#allocation6], 1 }
 0x2d4   :  { %348 = vsyncpa [#allocation4], 1 }
 0x2d5   :  { %350 = vsyncpa [#allocation4 + $0x1], 1 }

</bundles_post_ra>
